<compile_context>
chip_gen: v5e
topology: v5e:2x2
jax: 0.10.0
libtpu: 0.0.40
codegen_flags: <defaults>
</compile_context>

<pallas_src>
import jax
import jax.numpy as jnp
from jax.experimental import pallas as pl
from jax.experimental.pallas import tpu as pltpu


def _round_up(x: int, m: int) -> int:
    return ((x + m - 1) // m) * m


def _roi_box_predictor_kernel(x_ref, w_ref, b_ref, out_ref):
    """One ROI tile.

    x_ref:   (TN, C, HW)  native NCHW layout (HW on the lane axis)
    w_ref:   (C,  Kp)     fused [W_cls | W_bbox] * (1/HW), zero-padded to Kp
    b_ref:   (1,  Kp)     f32 fused [b_cls | b_bbox], zero-padded
    out_ref: (TN, Kp)     f32 fused [logits | bbox], lane-dense
    """
    # Global average pool: sum over the spatial (lane) axis, accumulated in
    # f32.  The 1/HW mean scale is pre-folded into w_ref (no VPU multiply).
    pooled = jnp.sum(x_ref[...].astype(jnp.float32), axis=-1)       # (TN, C)
    # Single fused MXU matmul (bf16 inputs, f32 accumulation) + bias add.
    out_ref[...] = (
        jnp.dot(pooled.astype(w_ref.dtype), w_ref[...],
                preferred_element_type=jnp.float32)
        + b_ref[...]
    )


def roi_box_predictor(x_nchw, w_cls, b_cls, w_bbox, b_bbox, *,
                      block_n: int = 256,
                      x_tile_budget_bytes: int = 6 * 1024 * 1024,
                      weight_dtype=jnp.bfloat16,
                      core_parallel: bool = False):
    """Forward pass.

    x_nchw: (N, C, H, W) pooled ROI features (f32 or bf16; pass bf16 from
            upstream to halve HBM read bytes).
    Returns (class_logits (N, num_classes), bbox_regression (N, num_bbox)).
    """
    n, c, h, w = x_nchw.shape
    hw = h * w
    num_classes = w_cls.shape[1]
    num_bbox = w_bbox.shape[1]
    k_out = num_classes + num_bbox
    k_pad = _round_up(k_out, 128)          # lane-dense, unmasked stores

    # Native-layout view of x (reshape only, no HBM data movement).
    x = x_nchw.reshape(n, c, hw)

    # ---- fused, lane-dense weight / bias slabs (tiny; built once) ----------
    inv_hw = 1.0 / float(hw)
    w_fused = jnp.zeros((c, k_pad), dtype=weight_dtype)
    w_fused = w_fused.at[:, :num_classes].set(
        (w_cls.astype(jnp.float32) * inv_hw).astype(weight_dtype))
    w_fused = w_fused.at[:, num_classes:k_out].set(
        (w_bbox.astype(jnp.float32) * inv_hw).astype(weight_dtype))
    b_fused = jnp.zeros((1, k_pad), dtype=jnp.float32)
    b_fused = b_fused.at[:, :num_classes].set(
        b_cls.astype(jnp.float32).reshape(1, -1))
    b_fused = b_fused.at[:, num_classes:k_out].set(
        b_bbox.astype(jnp.float32).reshape(1, -1))

    # ---- ROI tile size from a VMEM byte budget ------------------------------
    x_itemsize = jnp.dtype(x.dtype).itemsize
    bytes_per_roi = c * hw * x_itemsize
    max_tn = max(8, (x_tile_budget_bytes // max(bytes_per_roi, 1)) // 8 * 8)
    tn = max(8, min(block_n, max_tn, _round_up(n, 8)))

    grid = (pl.cdiv(n, tn),)   # ragged last block handled by Pallas masking

    w_itemsize = jnp.dtype(weight_dtype).itemsize
    est_vmem = (2 * tn * bytes_per_roi          # double-buffered x tiles
                + 2 * c * k_pad * w_itemsize    # resident weight slab buffers
                + 2 * k_pad * 4                 # bias
                + 2 * tn * k_pad * 4)           # double-buffered out tiles
    vmem_limit = int(min(max(4 * est_vmem, 32 * 1024 * 1024),
                         64 * 1024 * 1024))

    # CORE_PARALLEL splits independent ROI tiles across v7x's 2 TensorCores;
    # plain PARALLEL is the portable default on single-TC chips (v5e/v6e).
    roi_axis = pltpu.CORE_PARALLEL if core_parallel else pltpu.PARALLEL

    out_fused = pl.pallas_call(
        _roi_box_predictor_kernel,
        out_shape=jax.ShapeDtypeStruct((n, k_pad), jnp.float32),
        grid_spec=pltpu.PrefetchScalarGridSpec(
            num_scalar_prefetch=0,
            grid=grid,
            in_specs=[
                # x tiles stream (double-buffered) along the ROI axis, read
                # directly in NCHW layout — no HBM transpose, no pad copy.
                pl.BlockSpec((tn, c, hw), lambda i: (i, 0, 0)),
                # Fused weight / bias: constant index_map -> fetched once and
                # VMEM-resident across all grid steps.
                pl.BlockSpec((c, k_pad), lambda i: (0, 0)),
                pl.BlockSpec((1, k_pad), lambda i: (0, 0)),
            ],
            out_specs=pl.BlockSpec((tn, k_pad), lambda i: (i, 0)),
        ),
        compiler_params=pltpu.CompilerParams(
            dimension_semantics=(roi_axis,),
            vmem_limit_bytes=vmem_limit,
        ),
    )(x, w_fused, b_fused)

    class_logits = out_fused[:, :num_classes]
    bbox_regression = out_fused[:, num_classes:k_out]
    return class_logits, bbox_regression


if __name__ == "__main__":
    key = jax.random.PRNGKey(0)
    k_x, k_wc, k_bc, k_wb, k_bb = jax.random.split(key, 5)

    # Small shapes consistent with a 2D ROI box head.
    N, C, H, W = 2, 4, 16, 16          # ROIs, in_channels, pooled spatial
    n_dim = 2                          # 2D boxes -> 2*n_dim targets per class
    num_classes = 8
    num_bbox_out = num_classes * 2 * n_dim      # 32

    x_f32 = jax.random.normal(k_x, (N, C, H, W), dtype=jnp.float32)
    # Activations arrive in bf16 from upstream (halves HBM read bytes).
    x = x_f32.astype(jnp.bfloat16)
    w_cls = 0.02 * jax.random.normal(k_wc, (C, num_classes), dtype=jnp.float32)
    b_cls = 0.01 * jax.random.normal(k_bc, (1, num_classes), dtype=jnp.float32)
    w_bbox = 0.02 * jax.random.normal(k_wb, (C, num_bbox_out), dtype=jnp.float32)
    b_bbox = 0.01 * jax.random.normal(k_bb, (1, num_bbox_out), dtype=jnp.float32)

    logits, bbox = roi_box_predictor(x, w_cls, b_cls, w_bbox, b_bbox)
    jax.block_until_ready((logits, bbox))

    # Pure-JAX f32 reference on the same (bf16-quantized) activations; kernel
    # uses bf16 MXU inputs -> loosened tolerance.
    pooled_ref = jnp.mean(x.astype(jnp.float32).reshape(N, C, H * W), axis=-1)
    logits_ref = pooled_ref @ w_cls + b_cls
    bbox_ref = pooled_ref @ w_bbox + b_bbox

    assert logits.shape == (N, num_classes)
    assert bbox.shape == (N, num_bbox_out)
    assert jnp.allclose(logits, logits_ref, atol=5e-3), \
        float(jnp.max(jnp.abs(logits - logits_ref)))
    assert jnp.allclose(bbox, bbox_ref, atol=5e-3), \
        float(jnp.max(jnp.abs(bbox - bbox_ref)))

    print("KERNEL_OK")
</pallas_src>

<mosaic_0001>
module attributes {stable_mosaic.version = 11 : i64} {
  func.func @_roi_box_predictor_kernel(%arg0: i32, %arg1: memref<8x4x256xbf16, #tpu.memory_space<vmem>>, %arg2: memref<4x128xbf16, #tpu.memory_space<vmem>>, %arg3: memref<1x128xf32, #tpu.memory_space<vmem>>, %arg4: memref<8x128xf32, #tpu.memory_space<vmem>>) attributes {dimension_semantics = [#tpu.dimension_semantics<parallel>], iteration_bounds = array<i64: 1>, scalar_prefetch = 0 : i64, scratch_operands = 0 : i64, tpu.core_type = #tpu.core_type<tc>, window_params = [{transform_indices = @transform_0, window_bounds = array<i64: 8, 4, 256>}, {pipeline_mode = #tpu.pipeline_mode<synchronous>, transform_indices = @transform_1, window_bounds = array<i64: 4, 128>}, {pipeline_mode = #tpu.pipeline_mode<synchronous>, transform_indices = @transform_2, window_bounds = array<i64: 1, 128>}, {transform_indices = @transform_3, window_bounds = array<i64: 8, 128>}]} {
    %c0 = arith.constant 0 : index
    %c0_0 = arith.constant 0 : index
    %c0_1 = arith.constant 0 : index
    %0 = vector.load %arg1[%c0, %c0_0, %c0_1] : memref<8x4x256xbf16, #tpu.memory_space<vmem>>, vector<8x4x256xbf16>
    %1 = arith.extf %0 : vector<8x4x256xbf16> to vector<8x4x256xf32>
    %cst = arith.constant dense<0.000000e+00> : vector<8x4xf32>
    %2 = vector.multi_reduction <add>, %1, %cst [2] : vector<8x4x256xf32> to vector<8x4xf32>
    %3 = arith.truncf %2 : vector<8x4xf32> to vector<8x4xbf16>
    %c0_2 = arith.constant 0 : index
    %c0_3 = arith.constant 0 : index
    %4 = vector.load %arg2[%c0_2, %c0_3] : memref<4x128xbf16, #tpu.memory_space<vmem>>, vector<4x128xbf16>
    %cst_4 = arith.constant dense<0.000000e+00> : vector<8x128xf32>
    %5 = tpu.matmul %3, %4, %cst_4 {dimension_numbers = #tpu.dot_dimension_numbers<[1], [0], [0], [1], [0, 0, 1, 1], [], []>} : vector<8x4xbf16>, vector<4x128xbf16>, vector<8x128xf32> -> vector<8x128xf32>
    %c0_5 = arith.constant 0 : index
    %c0_6 = arith.constant 0 : index
    %6 = vector.load %arg3[%c0_5, %c0_6] : memref<1x128xf32, #tpu.memory_space<vmem>>, vector<1x128xf32>
    %7 = vector.broadcast %6 : vector<1x128xf32> to vector<8x128xf32>
    %8 = arith.addf %5, %7 : vector<8x128xf32>
    %c0_7 = arith.constant 0 : index
    %c0_8 = arith.constant 0 : index
    %9 = vector.load %arg4[%c0_7, %c0_8] : memref<8x128xf32, #tpu.memory_space<vmem>>, vector<8x128xf32>
    tpu.vector_store %arg4[%c0_7, %c0_8], %8 {strides = array<i32>} : memref<8x128xf32, #tpu.memory_space<vmem>>, vector<8x128xf32>,
    return
  }
  func.func @transform_0(%arg0: i32) -> (i32, i32, i32) {
    %c0_i32 = arith.constant 0 : i32
    %c0_i32_0 = arith.constant 0 : i32
    %c0_i32_1 = arith.constant 0 : i32
    return %arg0, %c0_i32, %c0_i32_0 : i32, i32, i32
  }
  func.func @transform_1(%arg0: i32) -> (i32, i32) {
    %c0_i32 = arith.constant 0 : i32
    %c0_i32_0 = arith.constant 0 : i32
    %c0_i32_1 = arith.constant 0 : i32
    return %c0_i32, %c0_i32_0 : i32, i32
  }
  func.func @transform_2(%arg0: i32) -> (i32, i32) {
    %c0_i32 = arith.constant 0 : i32
    %c0_i32_0 = arith.constant 0 : i32
    %c0_i32_1 = arith.constant 0 : i32
    return %c0_i32, %c0_i32_0 : i32, i32
  }
  func.func @transform_3(%arg0: i32) -> (i32, i32) {
    %c0_i32 = arith.constant 0 : i32
    %c0_i32_0 = arith.constant 0 : i32
    return %arg0, %c0_i32 : i32, i32
  }
}

</mosaic_0001>

<bundles_post_ra>
// kernel: tpu_custom_call.1
= control target key start
LH: loop header
LB: loop body
LE: loop exit
PB: predicated region body
PF: predicated region fallthrough
CT: control target
= control target key end

     0   :  { %8 = vsyncpa [#allocation3], 0  ;;  %s411_s0 = inlined_call_operand.hbm [shape: bf16[2,4,256], index: 0, kind: input, shape index: {}]   ;;  %s412_s1 = inlined_call_operand.hbm [shape: bf16[4,128], index: 1, kind: input, shape index: {}]   ;;  %s413_s2 = inlined_call_operand.vmem [shape: f32[1,128], index: 2, kind: input, shape index: {}]   ;;  %s414_s3 = inlined_call_operand.hbm [shape: f32[2,128], index: 3, kind: output, shape index: {}]  }
   0x1   :  { %9 = vsyncpa [#allocation6], 0 }
   0x2   :  { %10 = vsyncpa [#allocation4], 0 }
   0x3   :  { %14 = vsyncadd [#allocation3], 384  ;;  %s15_s14 = sshll.u32 %s411_s0, 4  ;;  %s356_s15 = smov [#allocation2]   ;;  %s16_s14 = int_to_ptr.hbm [resolvable:$true] %s15_s14 }
   0x4   :  { %s17_s16 = sshll.u32 %s356_s15, 4  ;;  %s29_s19 = sshll.u32 %s412_s1, 4  ;;  %s18_s16 = int_to_ptr.vmem [resolvable:$true] %s17_s16  ;;  %s30_s19 = int_to_ptr.hbm [resolvable:$true] %s29_s19 }
   0x5   :  { %s357_s20 = smov 64   ;;  %s358_s21 = smov 4  }
   0x6   :  { %23 = dma.hbm_to_vmem [thread:$0]  %s16_s14, 128, %s18_s16, [#allocation3], %s357_s20, %s357_s20, %s358_s21  }
   0x7   :  { %s359_s22 = smov [#allocation5]  }
   0x8   :  { %s31_s23 = sshll.u32 %s359_s22, 4  ;;  %s32_s23 = int_to_ptr.vmem [resolvable:$true] %s31_s23 }
   0x9   :  { %34 = dma.hbm_to_vmem [thread:$0]  %s30_s19, 32, %s32_s23, [#allocation6]  }
   0xa   :  { %350 = dma.done.wait [#allocation3], 512  }
   0xb   :  { %351 = vsyncadd [#allocation3], 4294966784 }
   0xc   :  { %352 = dma.done.wait [#allocation6], 32  }
   0xd   :  { %353 = vsyncadd [#allocation6], 4294967264  ;;  %v252_v0 = vld [vmem:[#allocation2] sm:$0xff]   ;;  %v267_v1 = vld [vmem:[#allocation2 + $0x8] sm:$0xff]   ;;  %vm113_vm0 = vcmask 1043456   ;;  %vm212_vm1 = vcmask 1041408   ;;  %v183_v56 = vlaneseq }
   0xe   :  { %v253_v2 = vunpack.c.l.bf16 %v252_v0  ;;  %v257_v3 = vunpack.c.l.bf16 %v267_v1  ;;  %v254_v4 = vunpack.c.h.bf16 %v252_v0  ;;  %v258_v5 = vunpack.c.h.bf16 %v267_v1  ;;  %v268_v6 = vld [vmem:[#allocation2 + $0x10] sm:$0xff]   ;;  %v269_v7 = vld [vmem:[#allocation2 + $0x18] sm:$0xff]   ;;  %v162_v52 = vld [vmem:[#allocation5] sm:$0x3] }
   0xf   :  { %v261_v8 = vunpack.c.l.bf16 %v268_v6  ;;  %v265_v9 = vunpack.c.l.bf16 %v269_v7  ;;  %v262_v14 = vunpack.c.h.bf16 %v268_v6  ;;  %v266_v20 = vunpack.c.h.bf16 %v269_v7 }
  0x10   :  { %70 = vst [vmem:[#allocation1] ss:$2 sm:$0xff] %v253_v2  ;;  %v214_v53 = vsel %vm212_vm1, %v162_v52, 0  ;;  %v184_v61 = vand.u32 127, %v183_v56  ;;  %vm193_vm2 = vcmask 1041409   ;;  %vm195_vm3 = vcmask 1042434  }
  0x11   :  { %78 = vst [vmem:[#allocation1 + $0x20] ss:$2 sm:$0xff] %v257_v3  ;;  %223 = vmatpush.bf16.msra.mxu0 %v214_v53  ;;  %vm197_vm4 = vcmask 1043459   ;;  %vm199_vm5 = vcmask 1044484   ;;  %vm201_vm6 = vcmask 1045509   ;;  %vm203_vm7 = vcmask 1046534  }
  0x12   :  { %74 = vst [vmem:[#allocation1 + $0x10] ss:$2 sm:$0xff] %v254_v4  ;;  %vm205_vm8 = vcmask 1047559   ;;  %vm208_vm9 = vcmask 31744  }
  0x13   :  { %82 = vst [vmem:[#allocation1 + $0x30] ss:$2 sm:$0xff] %v258_v5 }
  0x17   :  { %v71_v10 = vld.sshfl [vmem:[#allocation1] sm:$0xff pattern:$0x75316420]  ;;  %v72_v11 = vld.sshfl [vmem:[#allocation1 + $0x8] sm:$0xff pattern:$0x75316420] }
  0x18   :  { %v114_v12 = vsel %vm113_vm0, %v71_v10, 0.0  ;;  %v115_v13 = vsel %vm113_vm0, %v72_v11, 0.0  ;;  %85 = vst [vmem:[#allocation1] ss:$2 sm:$0xff] %v261_v8 }
  0x19   :  { %v116_v15 = vadd.f32 %v115_v13, %v114_v12  ;;  %v79_v16 = vld.sshfl [vmem:[#allocation1 + $0x20] sm:$0xff pattern:$0x75316420]  ;;  %v80_v17 = vld.sshfl [vmem:[#allocation1 + $0x28] sm:$0xff pattern:$0x75316420] }
  0x1a   :  { %v124_v18 = vsel %vm113_vm0, %v79_v16, 0.0  ;;  %v125_v19 = vsel %vm113_vm0, %v80_v17, 0.0  ;;  %91 = vst [vmem:[#allocation1 + $0x20] ss:$2 sm:$0xff] %v265_v9 }
  0x1b   :  { %117 = vadd.xlane.f32.xlu0 %v116_v15  ;;  %v126_v21 = vadd.f32 %v125_v19, %v124_v18  ;;  %v75_v22 = vld.sshfl [vmem:[#allocation1 + $0x10] sm:$0xff pattern:$0x75316420]  ;;  %v76_v23 = vld.sshfl [vmem:[#allocation1 + $0x18] sm:$0xff pattern:$0x75316420] }
  0x1c   :  { %88 = vst [vmem:[#allocation1 + $0x10] ss:$2 sm:$0xff] %v262_v14  ;;  %v119_v24 = vsel %vm113_vm0, %v75_v22, 0.0  ;;  %v120_v25 = vsel %vm113_vm0, %v76_v23, 0.0 }
  0x1d   :  { %127 = vadd.xlane.f32.xlu1 %v126_v21  ;;  %v83_v26 = vld.sshfl [vmem:[#allocation1 + $0x30] sm:$0xff pattern:$0x75316420]  ;;  %v84_v27 = vld.sshfl [vmem:[#allocation1 + $0x38] sm:$0xff pattern:$0x75316420]  ;;  %v121_v30 = vadd.f32 %v120_v25, %v119_v24 }
  0x1e   :  { %94 = vst [vmem:[#allocation1 + $0x30] ss:$2 sm:$0xff] %v266_v20  ;;  %v129_v28 = vsel %vm113_vm0, %v83_v26, 0.0  ;;  %v130_v29 = vsel %vm113_vm0, %v84_v27, 0.0 }
  0x1f   :  { %v86_v31 = vld.sshfl [vmem:[#allocation1] sm:$0xff pattern:$0x75316420]  ;;  %v87_v32 = vld.sshfl [vmem:[#allocation1 + $0x8] sm:$0xff pattern:$0x75316420]  ;;  %v131_v36 = vadd.f32 %v130_v29, %v129_v28 }
  0x20   :  { %v134_v33 = vsel %vm113_vm0, %v86_v31, 0.0  ;;  %v135_v34 = vsel %vm113_vm0, %v87_v32, 0.0  ;;  %v277_v32 = vld [vmem:[%s413_s2] ss:$0 sm:$0xff] }
  0x21   :  { %v136_v35 = vadd.f32 %v135_v34, %v134_v33  ;;  %v92_v37 = vld.sshfl [vmem:[#allocation1 + $0x20] sm:$0xff pattern:$0x75316420]  ;;  %v93_v38 = vld.sshfl [vmem:[#allocation1 + $0x28] sm:$0xff pattern:$0x75316420] }
  0x22   :  { %v144_v43 = vsel %vm113_vm0, %v92_v37, 0.0  ;;  %v145_v44 = vsel %vm113_vm0, %v93_v38, 0.0 }
  0x23   :  { %122 = vadd.xlane.f32.xlu0 %v121_v30  ;;  %137 = vadd.xlane.f32.xlu2 %v136_v35  ;;  %v89_v39 = vld.sshfl [vmem:[#allocation1 + $0x10] sm:$0xff pattern:$0x75316420]  ;;  %v90_v40 = vld.sshfl [vmem:[#allocation1 + $0x18] sm:$0xff pattern:$0x75316420]  ;;  %v146_v50 = vadd.f32 %v145_v44, %v144_v43 }
  0x24   :  { %v139_v41 = vsel %vm113_vm0, %v89_v39, 0.0  ;;  %v140_v42 = vsel %vm113_vm0, %v90_v40, 0.0 }
  0x25   :  { %132 = vadd.xlane.f32.xlu1 %v131_v36  ;;  %v95_v45 = vld.sshfl [vmem:[#allocation1 + $0x30] sm:$0xff pattern:$0x75316420]  ;;  %v96_v46 = vld.sshfl [vmem:[#allocation1 + $0x38] sm:$0xff pattern:$0x75316420]  ;;  %v141_v49 = vadd.f32 %v140_v42, %v139_v41 }
  0x26   :  { %v149_v47 = vsel %vm113_vm0, %v95_v45, 0.0  ;;  %v150_v48 = vsel %vm113_vm0, %v96_v46, 0.0 }
  0x27   :  { %v151_v51 = vadd.f32 %v150_v48, %v149_v47 }
  0x2b   :  { %142 = vadd.xlane.f32.xlu2 %v141_v49  ;;  %147 = vadd.xlane.f32.xlu0 %v146_v50 }
  0x2d   :  { %152 = vadd.xlane.f32.xlu1 %v151_v51 }
  0x8e   :  { %v118_v54 = vpop.xlane.xlu0 %117 }
  0x8f   :  { %v154_v57 = vpack.c.bf16 %v118_v54, %v118_v54 }
  0x90   :  { %v128_v55 = vpop.xlane.xlu1 %127 }
  0x91   :  { %v156_v58 = vpack.c.bf16 %v128_v55, %v128_v55  ;;  %v175_v62 = vunpack.c.l.b16 %v154_v57 }
  0x93   :  { %v177_v0 = vunpack.c.l.b16 %v156_v58  ;;  %v185_v5 = vperm.slane %v175_v62, %v184_v61 }
  0x95   :  { %v187_v8 = vperm.slane %v177_v0, %v184_v61 }
  0x96   :  { %v123_v59 = vpop.xlane.xlu0 %122  ;;  %v138_v60 = vpop.xlane.xlu2 %137 }
  0x97   :  { %v155_v63 = vpack.c.bf16 %v123_v59, %v123_v59  ;;  %v158_v4 = vpack.c.bf16 %v138_v60, %v138_v60 }
  0x98   :  { %v133_v1 = vpop.xlane.xlu1 %132 }
  0x99   :  { %v176_v2 = vunpack.c.l.b16 %v155_v63  ;;  %v157_v3 = vpack.c.bf16 %v133_v1, %v133_v1  ;;  %v179_v11 = vunpack.c.l.b16 %v158_v4 }
  0x9b   :  { %v186_v6 = vperm.slane %v176_v2, %v184_v61  ;;  %v178_v7 = vunpack.c.l.b16 %v157_v3  ;;  %v189_v22 = vperm.slane %v179_v11, %v184_v61 }
  0x9d   :  { %v194_v9 = vsel %vm193_vm2, %v186_v6, %v185_v5  ;;  %v188_v10 = vperm.slane %v178_v7, %v184_v61 }
  0x9e   :  { %v196_v12 = vsel %vm195_vm3, %v187_v8, %v194_v9  ;;  %v143_v13 = vpop.xlane.xlu2 %142  ;;  %v148_v14 = vpop.xlane.xlu0 %147 }
  0x9f   :  { %v159_v15 = vpack.c.bf16 %v143_v13, %v143_v13  ;;  %v160_v16 = vpack.c.bf16 %v148_v14, %v148_v14  ;;  %v198_v18 = vsel %vm197_vm4, %v188_v10, %v196_v12 }
  0xa0   :  { %v153_v17 = vpop.xlane.xlu1 %152  ;;  %v200_v26 = vsel %vm199_vm5, %v189_v22, %v198_v18 }
  0xa1   :  { %v180_v19 = vunpack.c.l.b16 %v159_v15  ;;  %v181_v20 = vunpack.c.l.b16 %v160_v16  ;;  %v161_v21 = vpack.c.bf16 %v153_v17, %v153_v17 }
  0xa3   :  { %v190_v23 = vperm.slane %v180_v19, %v184_v61  ;;  %v191_v24 = vperm.slane %v181_v20, %v184_v61  ;;  %v182_v25 = vunpack.c.l.b16 %v161_v21 }
  0xa5   :  { %v202_v27 = vsel %vm201_vm6, %v190_v23, %v200_v26  ;;  %v192_v28 = vperm.slane %v182_v25, %v184_v61 }
  0xa6   :  { %v204_v29 = vsel %vm203_vm7, %v191_v24, %v202_v27 }
  0xa7   :  { %v206_v30 = vsel %vm205_vm8, %v192_v28, %v204_v29 }
  0xa8   :  { %v207_v31 = vpack.c.b16 %v206_v30, %v206_v30 }
  0xaa   :  { %250 = vmatmul.msk.bf16.vlgmr.msra.gmra.mxu0 %vm208_vm9, %v207_v31 }
 0x127   :  { %v225_v33 = vpop.f32.mrf.mxu0 }
 0x128   :  { %v226_v34 = vadd.f32 %v277_v32, %v225_v33 }
 0x12a   :  { %229 = vst [vmem:[#allocation7] sm:$0xff] %v226_v34 }
 0x12f   :  { %v227_v35 = vpop.f32.mrf.mxu0 }
 0x130   :  { %233 = vsyncadd [#allocation4], 96  ;;  %s236_s26 = sshll.u32 %s414_s3, 4  ;;  %s360_s27 = smov [#allocation7]   ;;  %s237_s26 = int_to_ptr.hbm [resolvable:$true] %s236_s26 }
 0x131   :  { %s234_s28 = sshll.u32 %s360_s27, 4  ;;  %s361_s29 = smov 32   ;;  %s235_s28 = int_to_ptr.vmem [resolvable:$true] %s234_s28 }
 0x132   :  { %s362_s30 = smov 2  }
 0x133   :  { %242 = dma.vmem_to_hbm [thread:$0]  %s235_s28, 32, %s237_s26, [#allocation4], %s361_s29, %s361_s29, %s362_s30  }
 0x134   :  { %354 = dma.done.wait [#allocation4], 128  }
 0x135   :  { %355 = vsyncadd [#allocation4], 4294967168 }
 0x136   :  { %247 = vsyncpa [#allocation3], 1 }
 0x137   :  { %248 = vsyncpa [#allocation6], 1 }
 0x138   :  { %249 = vsyncpa [#allocation4], 1 }

</bundles_post_ra>
